<compile_context>
chip_gen: v5e
topology: v5e:2x2
jax: 0.10.0
libtpu: 0.0.40
codegen_flags: <defaults>
</compile_context>

<pallas_src>
import jax
import jax.numpy as jnp
from jax import lax
from jax.experimental import pallas as pl
from jax.experimental.pallas import tpu as pltpu


def _decoder_kernel(x_ref, w_ref, b_ref, out_ref):
    # x_ref:   (TB, IN)   batch tile (batch on sublanes, IN on lanes)
    # w_ref:   (2D, IN)   full PyTorch Linear weight (resident across steps)
    # b_ref:   (2D, 1)    bias column
    # out_ref: (2D, TB)   lane-dense output (batch on lanes); rows [0, D) are
    #                     the mean, rows [D, 2D) are exp(logstd) = std.
    x = x_ref[...]
    w = w_ref[...]

    # W @ x.T without materializing any transpose: contract last dims of both.
    contract = (((1,), (1,)), ((), ()))
    y_t = lax.dot_general(w, x, contract, preferred_element_type=jnp.float32)
    y_t = y_t + b_ref[...]                       # (2D, 1) broadcasts over lanes

    d = out_ref.shape[0] // 2
    row = lax.broadcasted_iota(jnp.int32, y_t.shape, 0)
    # exp() only on the logstd sublanes; mean rows are passed through.
    y_t = jnp.where(row < d, y_t, jnp.exp(y_t))

    out_ref[...] = y_t.astype(out_ref.dtype)


def _round_down(x, m):
    return (x // m) * m


def _choose_block_b(batch, in_dim, itemsize, target_bytes=8 << 20):
    """Byte-sized batch tile: ~target_bytes of x per grid step, a multiple of
    128 (lane-dense output stores), capped for VMEM safety on v7x (64 MiB
    physical) and so the grid keeps >= 2 (prefer >= 4) steps for pipeline
    overlap and dual-TensorCore sharding."""
    if batch <= 128:
        return batch                                   # single tile

    tb = max(128, _round_down(target_bytes // (in_dim * itemsize), 128))

    # Keep at least 2 (prefer 4) grid steps when the batch allows it.
    min_steps = 4 if batch >= 4 * 128 else 2
    tb = min(tb, max(128, _round_down(batch // min_steps, 128)))

    # VMEM safety: double-buffered x tile must stay under ~24 MiB (v7x-safe
    # with the 48 MiB scoped limit set below).
    vmem_cap = _round_down((24 << 20) // (2 * in_dim * itemsize), 128)
    if vmem_cap >= 128:
        tb = min(tb, vmem_cap)
    # TODO(synk): for in_dim so large that even a 128-row tile blows the VMEM
    # budget, add a K grid axis ("arbitrary") with an f32 VMEM accumulator
    # instead of shrinking the batch tile further.

    return min(tb, batch)


def single_gaussian_decoder_std_forward(
    x, weight, bias, *, block_b=None, transpose_output=True, compute_dtype=None
):
    """Forward pass of SingleGaussianDecoderStd.

    x:      [B, input_dim]
    weight: [2*output_dim, input_dim]   (PyTorch nn.Linear layout)
    bias:   [2*output_dim]
    Returns (mean, std), each [B, output_dim] (or [output_dim, B] if
    transpose_output=False, which avoids an extra HBM pass).
    compute_dtype=jnp.bfloat16 halves x/W HBM traffic when precision allows;
    accumulation stays f32 in the kernel.
    """
    out_dtype = x.dtype
    batch, in_dim = x.shape
    two_d, w_in = weight.shape
    assert w_in == in_dim and two_d % 2 == 0
    d = two_d // 2

    if compute_dtype is not None:
        x = x.astype(compute_dtype)
        weight = weight.astype(compute_dtype)

    itemsize = jnp.dtype(x.dtype).itemsize
    tb = block_b if block_b is not None else _choose_block_b(batch, in_dim, itemsize)
    tb = min(tb, batch)
    grid = (pl.cdiv(batch, tb),)

    b_col = bias.astype(jnp.float32).reshape(two_d, 1)

    y_t = pl.pallas_call(
        _decoder_kernel,
        out_shape=jax.ShapeDtypeStruct((two_d, batch), out_dtype),
        grid_spec=pltpu.PrefetchScalarGridSpec(
            num_scalar_prefetch=0,
            grid=grid,
            in_specs=[
                pl.BlockSpec((tb, in_dim), lambda i: (i, 0)),       # x batch tile
                pl.BlockSpec((two_d, in_dim), lambda i: (0, 0)),    # W (resident)
                pl.BlockSpec((two_d, 1), lambda i: (0, 0)),         # bias column
            ],
            out_specs=pl.BlockSpec((two_d, tb), lambda i: (0, i)),  # fused output
        ),
        compiler_params=pltpu.CompilerParams(
            dimension_semantics=("parallel",),   # batch tiles shard across TCs
            vmem_limit_bytes=48 << 20,           # raise scoped default (v5e/v6e/v7x-safe)
        ),
    )(x, weight, b_col)

    mean_t = y_t[:d]
    std_t = y_t[d:]
    if transpose_output:
        # PyTorch (B, D) layout; cheap static slices + a 2-row transpose.
        return mean_t.T, std_t.T
    return mean_t, std_t


if __name__ == "__main__":
    # Small shapes consistent with the module: batch=8, input_dim=32, output_dim=2.
    B, INPUT_DIM, OUTPUT_DIM = 8, 32, 2

    key = jax.random.PRNGKey(0)
    kx, kw, kb = jax.random.split(key, 3)

    # Deterministic parameter init (uniform like PyTorch Linear default bound).
    bound = 1.0 / (INPUT_DIM ** 0.5)
    weight = jax.random.uniform(
        kw, (2 * OUTPUT_DIM, INPUT_DIM), jnp.float32, -bound, bound
    )
    bias = jax.random.uniform(kb, (2 * OUTPUT_DIM,), jnp.float32, -bound, bound)

    x = jax.random.normal(kx, (B, INPUT_DIM), jnp.float32)

    mean, std = single_gaussian_decoder_std_forward(x, weight, bias)
    jax.block_until_ready((mean, std))

    # Reference check against plain-JAX forward (matches the PyTorch module).
    y_ref = x @ weight.T + bias
    mean_ref = y_ref[:, :OUTPUT_DIM]
    std_ref = jnp.exp(y_ref[:, OUTPUT_DIM:])
    assert mean.shape == (B, OUTPUT_DIM) and std.shape == (B, OUTPUT_DIM)
    assert jnp.allclose(mean, mean_ref, atol=1e-5)
    assert jnp.allclose(std, std_ref, atol=1e-5)

    print("KERNEL_OK")
</pallas_src>

<mosaic_0001>
module attributes {stable_mosaic.version = 11 : i64} {
  func.func @_decoder_kernel(%arg0: i32, %arg1: memref<8x32xf32, #tpu.memory_space<vmem>>, %arg2: memref<4x32xf32, #tpu.memory_space<vmem>>, %arg3: memref<4x1xf32, #tpu.memory_space<vmem>>, %arg4: memref<4x8xf32, #tpu.memory_space<vmem>>) attributes {dimension_semantics = [#tpu.dimension_semantics<parallel>], iteration_bounds = array<i64: 1>, scalar_prefetch = 0 : i64, scratch_operands = 0 : i64, tpu.core_type = #tpu.core_type<tc>, window_params = [{transform_indices = @transform_0, window_bounds = array<i64: 8, 32>}, {pipeline_mode = #tpu.pipeline_mode<synchronous>, transform_indices = @transform_1, window_bounds = array<i64: 4, 32>}, {pipeline_mode = #tpu.pipeline_mode<synchronous>, transform_indices = @transform_2, window_bounds = array<i64: 4, 1>}, {transform_indices = @transform_3, window_bounds = array<i64: 4, 8>}]} {
    %c0 = arith.constant 0 : index
    %c0_0 = arith.constant 0 : index
    %0 = vector.load %arg1[%c0, %c0_0] : memref<8x32xf32, #tpu.memory_space<vmem>>, vector<8x32xf32>
    %c0_1 = arith.constant 0 : index
    %c0_2 = arith.constant 0 : index
    %1 = vector.load %arg2[%c0_1, %c0_2] : memref<4x32xf32, #tpu.memory_space<vmem>>, vector<4x32xf32>
    %cst = arith.constant dense<0.000000e+00> : vector<4x8xf32>
    %2 = tpu.matmul %1, %0, %cst {dimension_numbers = #tpu.dot_dimension_numbers<[1], [1], [0], [0], [0, 0, 1, 0], [], []>} : vector<4x32xf32>, vector<8x32xf32>, vector<4x8xf32> -> vector<4x8xf32>
    %c0_3 = arith.constant 0 : index
    %c0_4 = arith.constant 0 : index
    %3 = vector.load %arg3[%c0_3, %c0_4] : memref<4x1xf32, #tpu.memory_space<vmem>>, vector<4x1xf32>
    %4 = vector.broadcast %3 : vector<4x1xf32> to vector<4x8xf32>
    %5 = arith.addf %2, %4 : vector<4x8xf32>
    %6 = tpu.iota {dimensions = array<i32: 0>} : vector<4x8xi32>
    %c2_i32 = arith.constant 2 : i32
    %7 = vector.broadcast %c2_i32 : i32 to vector<4x8xi32>
    %8 = arith.cmpi slt, %6, %7 : vector<4x8xi32>
    %9 = math.exp %5 : vector<4x8xf32>
    %10 = arith.select %8, %5, %9 : vector<4x8xi1>, vector<4x8xf32>
    %c0_5 = arith.constant 0 : index
    %c0_6 = arith.constant 0 : index
    %11 = vector.load %arg4[%c0_5, %c0_6] : memref<4x8xf32, #tpu.memory_space<vmem>>, vector<4x8xf32>
    tpu.vector_store %arg4[%c0_5, %c0_6], %10 {strides = array<i32>} : memref<4x8xf32, #tpu.memory_space<vmem>>, vector<4x8xf32>,
    return
  }
  func.func @transform_0(%arg0: i32) -> (i32, i32) {
    %c0_i32 = arith.constant 0 : i32
    %c0_i32_0 = arith.constant 0 : i32
    return %arg0, %c0_i32 : i32, i32
  }
  func.func @transform_1(%arg0: i32) -> (i32, i32) {
    %c0_i32 = arith.constant 0 : i32
    %c0_i32_0 = arith.constant 0 : i32
    %c0_i32_1 = arith.constant 0 : i32
    return %c0_i32, %c0_i32_0 : i32, i32
  }
  func.func @transform_2(%arg0: i32) -> (i32, i32) {
    %c0_i32 = arith.constant 0 : i32
    %c0_i32_0 = arith.constant 0 : i32
    %c0_i32_1 = arith.constant 0 : i32
    return %c0_i32, %c0_i32_0 : i32, i32
  }
  func.func @transform_3(%arg0: i32) -> (i32, i32) {
    %c0_i32 = arith.constant 0 : i32
    %c0_i32_0 = arith.constant 0 : i32
    return %c0_i32, %arg0 : i32, i32
  }
}

</mosaic_0001>

<bundles_post_ra>
// kernel: tpu_custom_call.1
= control target key start
LH: loop header
LB: loop body
LE: loop exit
PB: predicated region body
PF: predicated region fallthrough
CT: control target
= control target key end

     0   :  { %8 = vsyncpa [#allocation3], 0  ;;  %s184_s0 = inlined_call_operand.hbm [shape: f32[8,32], index: 0, kind: input, shape index: {}]   ;;  %s185_s1 = inlined_call_operand.vmem [shape: f32[4,32], index: 1, kind: input, shape index: {}]   ;;  %s186_s2 = inlined_call_operand.vmem [shape: f32[4,1], index: 2, kind: input, shape index: {}]   ;;  %s187_s3 = inlined_call_operand.hbm [shape: f32[4,8], index: 3, kind: output, shape index: {}]  }
   0x1   :  { %9 = vsyncpa [#allocation4], 0  ;;  %s15_s14 = sshll.u32 %s184_s0, 4  ;;  %s149_s15 = smov [#allocation2]   ;;  %s16_s14 = int_to_ptr.hbm [resolvable:$true] %s15_s14 }
   0x2   :  { %s17_s16 = sshll.u32 %s149_s15, 4  ;;  %s18_s16 = int_to_ptr.vmem [resolvable:$true] %s17_s16 }
   0x3   :  { %20 = dma.hbm_to_vmem [thread:$0]  %s16_s14, 128, %s18_s16, [#allocation3]  }
   0x4   :  { %145 = dma.done.wait [#allocation3], 128  }
   0x5   :  { %146 = vsyncadd [#allocation3], 4294967168  ;;  %v150_v0 = vmov 0   ;;  %vm37_vm0 = vcmask 261120   ;;  %v29_v1 = vld [vmem:[#allocation2] sm:$0xff]  ;;  %v64_v7 = vlaneseq  ;;  %s151_s0 = smov [#allocation5]  }
   0x6   :  { %94 = vset.pattern.permute.xlu0 %v150_v0  ;;  %v31_v2 = vld [vmem:[%s186_s2] sm:$0xf]  ;;  %89 = vmatpush.xpose.msk.msra.mxu0 %vm37_vm0, %v29_v1  ;;  %s77_s21 = sshll.u32 %s151_s0, 4  ;;  %s79_s2 = sshll.u32 %s187_s3, 4  ;;  %vm70_vm2 = vcmask 60416   ;;  %s78_s21 = int_to_ptr.vmem [resolvable:$true] %s77_s21  ;;  %s80_s2 = int_to_ptr.hbm [resolvable:$true] %s79_s2 }
   0x7   :  { %v30_v3 = vld [vmem:[%s185_s1] sm:$0xf]  ;;  %34 = vperm.xlu0 %94, %v31_v2   ;;  %v65_v9 = vshrl.u32 %v64_v7, 7 }
   0x9   :  { %90 = vmatmul.msk.f32.vlgmr.msra.gmra.mxu0 %vm37_vm0, %v30_v3  ;;  %vm66_vm1 = vcmp.lt.s32.totalorder %v65_v9, 2 }
  0x79   :  { %v35_v4 = vpop.permute.xlu0 %34 }
  0x86   :  { %v61_v5 = vpop.f32.mrf.mxu0 }
  0x87   :  { %v62_v6 = vadd.f32 %v61_v5, %v35_v4 }
  0x89   :  { %v67_v8 = vmul.f32 1.442695, %v62_v6 }
  0x8b   :  { %95 = vpow2.f32 %v67_v8 }
  0x91   :  { %v96_v10 = vpop.eup %95 }
  0x92   :  { %v69_v11 = vsel %vm66_vm1, %v62_v6, %v96_v10 }
  0x93   :  { %71 = vst.msk [vmem:[#allocation5] sm:$0xf] %vm70_vm2, %v69_v11 }
  0x94   :  { %82 = dma.vmem_to_hbm [thread:$0]  %s78_s21, 64, %s80_s2, [#allocation4]  }
  0x95   :  { %147 = dma.done.wait [#allocation4], 64  }
  0x96   :  { %148 = vsyncadd [#allocation4], 4294967232 }
  0x97   :  { %87 = vsyncpa [#allocation3], 1 }
  0x98   :  { %88 = vsyncpa [#allocation4], 1 }

</bundles_post_ra>
